<compile_context>
chip_gen: v7x
topology: tpu7x:2x2x1
jax: 0.10.0
libtpu: 0.0.40
codegen_flags: <defaults>
</compile_context>

<pallas_src>
import functools

import jax
import jax.numpy as jnp
from jax.experimental import pallas as pl
from jax.experimental.pallas import tpu as pltpu

BN_EPS = 1e-5


# ------------------------------ Pallas kernels --------------------------------
def _tap_gemm_kernel(x_ref, w_ref, b_ref, o_ref, acc_ref, *, apply_relu):
    """out[tile] = relu?( sum_t  x[t, tile] @ w[t]  + bias )

    grid = (M_tiles, T): axis 0 "parallel" (independent output row tiles),
                         axis 1 "arbitrary" (conv-tap reduction, innermost).
    x_ref  : (1, tm, Cin)   bf16  current tap slab for this M tile
    w_ref  : (1, Cin, Cout) bf16  current tap weights (BN scale pre-folded)
    b_ref  : (1, Cout)      f32   folded bias
    o_ref  : (tm, Cout)     f32   output tile (resident across the tap axis)
    acc_ref: (tm, Cout)     f32   VMEM accumulator scratch
    """
    t = pl.program_id(1)

    @pl.when(t == 0)
    def _():
        acc_ref[...] = jnp.zeros_like(acc_ref)

    acc_ref[...] += jnp.dot(x_ref[0], w_ref[0],
                            preferred_element_type=jnp.float32)

    @pl.when(t == pl.num_programs(1) - 1)
    def _():
        y = acc_ref[...] + b_ref[...]
        if apply_relu:
            y = jnp.maximum(y, 0.0)
        o_ref[...] = y.astype(o_ref.dtype)


def _maxpool3x3_kernel(xp_ref, o_ref, *, H, W):
    """3x3 max pool, stride 1.  xp_ref: (H+2, W+2, N, C), padded with -inf.

    Spatial dims are leading dims, so each shifted window is a plain
    leading-dim slice (no sublane/lane relayout)."""
    m = xp_ref[0:H, 0:W, :, :]
    for dy in range(3):
        for dx in range(3):
            if dy == 0 and dx == 0:
                continue
            m = jnp.maximum(m, xp_ref[dy:dy + H, dx:dx + W, :, :])
    o_ref[...] = m


# ------------------------------ Pallas wrappers --------------------------------
def _pick_tile_m(m, target=256):
    """Largest multiple of 8 that divides m and is <= target (else m itself)."""
    best = None
    for tm in range(8, min(m, target) + 1, 8):
        if m % tm == 0:
            best = tm
    return best if best is not None else m


def fused_tap_gemm(taps, weights, bias, apply_relu):
    """taps: (T, M, Cin); weights: (T, Cin, Cout); bias: (Cout,) -> (M, Cout) f32."""
    T, M, Cin = taps.shape
    T2, Cin2, Cout = weights.shape
    assert (T, Cin) == (T2, Cin2), (taps.shape, weights.shape)
    tm = _pick_tile_m(M)

    x_bf = taps.astype(jnp.bfloat16)       # bf16 MXU operands
    w_bf = weights.astype(jnp.bfloat16)
    b2 = bias.reshape(1, Cout).astype(jnp.float32)

    cost = pl.CostEstimate(
        flops=2 * T * M * Cin * Cout,
        transcendentals=0,
        bytes_accessed=int(x_bf.size) * 2 + int(w_bf.size) * 2
        + int(b2.size) * 4 + M * Cout * 4,
    )

    kernel = functools.partial(_tap_gemm_kernel, apply_relu=apply_relu)
    return pl.pallas_call(
        kernel,
        out_shape=jax.ShapeDtypeStruct((M, Cout), jnp.float32),
        grid_spec=pltpu.PrefetchScalarGridSpec(
            num_scalar_prefetch=0,
            grid=(M // tm, T),
            in_specs=[
                pl.BlockSpec((1, tm, Cin), lambda i, t: (t, i, 0)),
                pl.BlockSpec((1, Cin, Cout), lambda i, t: (t, 0, 0)),
                pl.BlockSpec((1, Cout), lambda i, t: (0, 0)),
            ],
            out_specs=pl.BlockSpec((tm, Cout), lambda i, t: (i, 0)),
            scratch_shapes=[pltpu.VMEM((tm, Cout), jnp.float32)],
        ),
        compiler_params=pltpu.CompilerParams(
            dimension_semantics=("parallel", "arbitrary")),
        cost_estimate=cost,
    )(x_bf, w_bf, b2)


def maxpool3x3_s1(x_nhwc):
    """MaxPool2d(kernel_size=3, stride=1, padding=1) on NHWC input."""
    N, H, W, C = x_nhwc.shape
    xp = jnp.pad(x_nhwc, ((0, 0), (1, 1), (1, 1), (0, 0)),
                 constant_values=-jnp.inf)
    xp = jnp.transpose(xp, (1, 2, 0, 3))           # (Hp, Wp, N, C)
    out = pl.pallas_call(
        functools.partial(_maxpool3x3_kernel, H=H, W=W),
        out_shape=jax.ShapeDtypeStruct((H, W, N, C), x_nhwc.dtype),
        grid=(1,),
        in_specs=[pl.BlockSpec((H + 2, W + 2, N, C), lambda i: (0, 0, 0, 0))],
        out_specs=pl.BlockSpec((H, W, N, C), lambda i: (0, 0, 0, 0)),
    )(xp)
    return jnp.transpose(out, (2, 0, 1, 3))        # back to (N, H, W, C)


# ------------------------------ layer glue (JAX) -------------------------------
def _extract_conv_taps(x_nhwc, k):
    """KxK, stride 1, 'same' padding -> (K*K, N*H*W, C) tap slabs, (dy, dx) order."""
    N, H, W, C = x_nhwc.shape
    if k == 1:
        return x_nhwc.reshape(1, N * H * W, C)
    pad = k // 2
    xp = jnp.pad(x_nhwc, ((0, 0), (pad, pad), (pad, pad), (0, 0)))
    taps = [xp[:, dy:dy + H, dx:dx + W, :].reshape(N * H * W, C)
            for dy in range(k) for dx in range(k)]
    return jnp.stack(taps, axis=0)


def conv_bn_act(x_nhwc, p, k):
    """Conv2d(kxk, stride 1, 'same') + BatchNorm2d(eval) + ReLU via fused Pallas GEMM."""
    N, H, W, Cin = x_nhwc.shape
    kh, kw, cin, cout = p["w"].shape
    assert (kh, kw, cin) == (k, k, Cin), (p["w"].shape, k, Cin)
    scale = p["gamma"] / jnp.sqrt(p["var"] + BN_EPS)           # BN eval fold
    bias = (p["b"] - p["mean"]) * scale + p["beta"]
    w = (p["w"] * scale[None, None, None, :]).reshape(k * k, Cin, cout)
    taps = _extract_conv_taps(x_nhwc, k)
    out2d = fused_tap_gemm(taps, w, bias, apply_relu=True)     # act_fn = ReLU
    return out2d.reshape(N, H, W, cout)


# --------------------------- parameter construction ----------------------------
def _init_conv_bn(key, cin, cout, k):
    std = (2.0 / (cin * k * k)) ** 0.5
    return dict(
        w=std * jax.random.normal(key, (k, k, cin, cout), dtype=jnp.float32),
        b=jnp.zeros((cout,), jnp.float32),
        gamma=jnp.ones((cout,), jnp.float32),   # BatchNorm eval-mode defaults
        beta=jnp.zeros((cout,), jnp.float32),
        mean=jnp.zeros((cout,), jnp.float32),
        var=jnp.ones((cout,), jnp.float32),
    )


def init_inception_block(key, c_in, c_red, c_out):
    k = jax.random.split(key, 6)
    return dict(
        conv_1x1=_init_conv_bn(k[0], c_in, c_out["1x1"], 1),
        conv_3x3_red=_init_conv_bn(k[1], c_in, c_red["3x3"], 1),
        conv_3x3=_init_conv_bn(k[2], c_red["3x3"], c_out["3x3"], 3),
        conv_5x5_red=_init_conv_bn(k[3], c_in, c_red["5x5"], 1),
        conv_5x5=_init_conv_bn(k[4], c_red["5x5"], c_out["5x5"], 5),
        conv_max=_init_conv_bn(k[5], c_in, c_out["max"], 1),
    )


# ---------------------------------- forward ------------------------------------
def inception_block_forward(params, x_nchw):
    # PyTorch NCHW -> NHWC (kernel layout)
    x = jnp.transpose(x_nchw, (0, 2, 3, 1)).astype(jnp.float32)

    x_1x1 = conv_bn_act(x, params["conv_1x1"], 1)

    x_3x3 = conv_bn_act(x, params["conv_3x3_red"], 1)
    x_3x3 = conv_bn_act(x_3x3, params["conv_3x3"], 3)

    x_5x5 = conv_bn_act(x, params["conv_5x5_red"], 1)
    x_5x5 = conv_bn_act(x_5x5, params["conv_5x5"], 5)

    x_max = maxpool3x3_s1(x)
    x_max = conv_bn_act(x_max, params["conv_max"], 1)

    # torch.cat([...], dim=1) == channel concat; NHWC concat on the last axis.
    out = jnp.concatenate([x_1x1, x_3x3, x_5x5, x_max], axis=-1)
    return jnp.transpose(out, (0, 3, 1, 2))   # back to NCHW


if __name__ == "__main__":
    c_in = 4
    c_red = {"3x3": 4, "5x5": 4}
    c_out = {"1x1": 8, "3x3": 8, "5x5": 8, "max": 8}

    key = jax.random.PRNGKey(0)
    k_params, k_x = jax.random.split(key)
    params = init_inception_block(k_params, c_in, c_red, c_out)
    x = jax.random.normal(k_x, (2, c_in, 16, 16), dtype=jnp.float32)

    out = inception_block_forward(params, x)
    out = jax.block_until_ready(out)
    assert out.shape == (2, sum(c_out.values()), 16, 16), out.shape
    print("KERNEL_OK")
</pallas_src>

<mosaic_0001>
module attributes {stable_mosaic.version = 11 : i64} {
  func.func @_tap_gemm_kernel(%arg0: i32, %arg1: i32, %arg2: memref<1x256x4xbf16, #tpu.memory_space<vmem>>, %arg3: memref<1x4x8xbf16, #tpu.memory_space<vmem>>, %arg4: memref<1x8xf32, #tpu.memory_space<vmem>>, %arg5: memref<256x8xf32, #tpu.memory_space<vmem>>, %arg6: memref<256x8xf32, #tpu.memory_space<vmem>>) attributes {dimension_semantics = [#tpu.dimension_semantics<parallel>, #tpu.dimension_semantics<arbitrary>], iteration_bounds = array<i64: 2, 1>, scalar_prefetch = 0 : i64, scratch_operands = 1 : i64, tpu.core_type = #tpu.core_type<tc>, window_params = [{transform_indices = @transform_0, window_bounds = array<i64: 1, 256, 4>}, {transform_indices = @transform_1, window_bounds = array<i64: 1, 4, 8>}, {pipeline_mode = #tpu.pipeline_mode<synchronous>, transform_indices = @transform_2, window_bounds = array<i64: 1, 8>}, {transform_indices = @transform_3, window_bounds = array<i64: 256, 8>}]} {
    %c0_i32 = arith.constant 0 : i32
    %0 = arith.cmpi eq, %arg1, %c0_i32 : i32
    %1 = arith.extui %0 : i1 to i32
    %c0_i32_0 = arith.constant 0 : i32
    %2 = arith.cmpi ne, %1, %c0_i32_0 : i32
    scf.if %2 {
      %cst_12 = arith.constant 0.000000e+00 : f32
      %14 = vector.broadcast %cst_12 : f32 to vector<256x8xf32>
      %c0_13 = arith.constant 0 : index
      %c0_14 = arith.constant 0 : index
      %15 = vector.load %arg6[%c0_13, %c0_14] : memref<256x8xf32, #tpu.memory_space<vmem>>, vector<256x8xf32>
      tpu.vector_store %arg6[%c0_13, %c0_14], %14 {strides = array<i32>} : memref<256x8xf32, #tpu.memory_space<vmem>>, vector<256x8xf32>,
    } else {
    }
    %c0 = arith.constant 0 : index
    %c0_1 = arith.constant 0 : index
    %3 = vector.load %arg6[%c0, %c0_1] : memref<256x8xf32, #tpu.memory_space<vmem>>, vector<256x8xf32>
    %c0_2 = arith.constant 0 : index
    %c0_3 = arith.constant 0 : index
    %c0_4 = arith.constant 0 : index
    %4 = vector.load %arg2[%c0_2, %c0_3, %c0_4] : memref<1x256x4xbf16, #tpu.memory_space<vmem>>, vector<1x256x4xbf16>
    %5 = vector.shape_cast %4 : vector<1x256x4xbf16> to vector<256x4xbf16>
    %c0_5 = arith.constant 0 : index
    %c0_6 = arith.constant 0 : index
    %c0_7 = arith.constant 0 : index
    %6 = vector.load %arg3[%c0_5, %c0_6, %c0_7] : memref<1x4x8xbf16, #tpu.memory_space<vmem>>, vector<1x4x8xbf16>
    %7 = vector.shape_cast %6 : vector<1x4x8xbf16> to vector<4x8xbf16>
    %cst = arith.constant dense<0.000000e+00> : vector<256x8xf32>
    %8 = tpu.matmul %5, %7, %cst {dimension_numbers = #tpu.dot_dimension_numbers<[1], [0], [0], [1], [0, 0, 1, 1], [], []>} : vector<256x4xbf16>, vector<4x8xbf16>, vector<256x8xf32> -> vector<256x8xf32>
    %9 = arith.addf %3, %8 : vector<256x8xf32>
    %c0_8 = arith.constant 0 : index
    %c0_9 = arith.constant 0 : index
    %10 = vector.load %arg6[%c0_8, %c0_9] : memref<256x8xf32, #tpu.memory_space<vmem>>, vector<256x8xf32>
    tpu.vector_store %arg6[%c0_8, %c0_9], %9 {strides = array<i32>} : memref<256x8xf32, #tpu.memory_space<vmem>>, vector<256x8xf32>,
    %c0_i32_10 = arith.constant 0 : i32
    %11 = arith.cmpi eq, %arg1, %c0_i32_10 : i32
    %12 = arith.extui %11 : i1 to i32
    %c0_i32_11 = arith.constant 0 : i32
    %13 = arith.cmpi ne, %12, %c0_i32_11 : i32
    scf.if %13 {
      %c0_12 = arith.constant 0 : index
      %c0_13 = arith.constant 0 : index
      %14 = vector.load %arg6[%c0_12, %c0_13] : memref<256x8xf32, #tpu.memory_space<vmem>>, vector<256x8xf32>
      %c0_14 = arith.constant 0 : index
      %c0_15 = arith.constant 0 : index
      %15 = vector.load %arg4[%c0_14, %c0_15] : memref<1x8xf32, #tpu.memory_space<vmem>>, vector<1x8xf32>
      %16 = vector.broadcast %15 : vector<1x8xf32> to vector<256x8xf32>
      %17 = arith.addf %14, %16 : vector<256x8xf32>
      %cst_16 = arith.constant 0.000000e+00 : f32
      %18 = vector.broadcast %cst_16 : f32 to vector<256x8xf32>
      %19 = arith.maximumf %17, %18 : vector<256x8xf32>
      %c0_17 = arith.constant 0 : index
      %c0_18 = arith.constant 0 : index
      %20 = vector.load %arg5[%c0_17, %c0_18] : memref<256x8xf32, #tpu.memory_space<vmem>>, vector<256x8xf32>
      tpu.vector_store %arg5[%c0_17, %c0_18], %19 {strides = array<i32>} : memref<256x8xf32, #tpu.memory_space<vmem>>, vector<256x8xf32>,
    } else {
    }
    return
  }
  func.func @transform_0(%arg0: i32, %arg1: i32) -> (i32, i32, i32) {
    %c0_i32 = arith.constant 0 : i32
    %c0_i32_0 = arith.constant 0 : i32
    return %arg1, %arg0, %c0_i32 : i32, i32, i32
  }
  func.func @transform_1(%arg0: i32, %arg1: i32) -> (i32, i32, i32) {
    %c0_i32 = arith.constant 0 : i32
    %c0_i32_0 = arith.constant 0 : i32
    %c0_i32_1 = arith.constant 0 : i32
    return %arg1, %c0_i32, %c0_i32_0 : i32, i32, i32
  }
  func.func @transform_2(%arg0: i32, %arg1: i32) -> (i32, i32) {
    %c0_i32 = arith.constant 0 : i32
    %c0_i32_0 = arith.constant 0 : i32
    %c0_i32_1 = arith.constant 0 : i32
    return %c0_i32, %c0_i32_0 : i32, i32
  }
  func.func @transform_3(%arg0: i32, %arg1: i32) -> (i32, i32) {
    %c0_i32 = arith.constant 0 : i32
    %c0_i32_0 = arith.constant 0 : i32
    return %arg0, %c0_i32 : i32, i32
  }
}

</mosaic_0001>

<bundles_post_ra>
// kernel: tpu_custom_call.1
= control target key start
LH: loop header
LB: loop body
LE: loop exit
PB: predicated region body
PF: predicated region fallthrough
CT: control target
= control target key end

     0   :  { %s1089_s12 = smov 0   ;;  %s1091_s13 = smov 0   ;;  %s1343_s0 = inlined_call_operand.vmem [shape: bf16[1,512,4], index: 0, kind: input, shape index: {}]   ;;  %s1344_s1 = inlined_call_operand.vmem [shape: bf16[1,4,8], index: 1, kind: input, shape index: {}]   ;;  %s1345_s2 = inlined_call_operand.vmem [shape: f32[1,8], index: 2, kind: input, shape index: {}]   ;;  %s1346_s3 = inlined_call_operand.vmem [shape: f32[512,8], index: 3, kind: output, shape index: {}]  }
   0x1   :  { %s1093_s14 = smov 0  }
   0x2 LB: > { %s25_s15 = sadd.s32 1, %s1062_s13  ;;  %p908_p0 = scmp.ge.s32.totalorder %s1066_s14, 1  ;;  %s1066_s14 = sphi %s1093_s14, %s13_s14   ;;  %s1062_s13 = sphi %s1091_s13, %s1349_s13   ;;  %s1058_s12 = sphi %s1089_s12, %s1348_s12  }
   0x3   : > { %p27_p1 = scmp.ge.s32.totalorder %s25_s15, 2  ;;  %p165_p2 = scmp.lt.s32.totalorder %s1066_s14, 3 }
   0x5   : > { %s1351_s15 = smov (%p27_p1, %s25_s15), 0  ;;  %p166_p3 = pnand %p908_p0, %p165_p2 }
   0x6   : > { %v319_v0 = vld [vmem:[%s1344_s1] sm:$0x3] (!%p166_p3)  ;;  %vm449_vm0 = vcmask (!%p166_p3), 1041408   ;;  %s909_s18 = sshll.u32 (!%p166_p3), %s1058_s12, 5  ;;  %vm222_vm1 = vcmask (!%p166_p3), 64512   ;;  %v1068_v2 = vmov (!%p166_p3), 0.0  }
   0x7   : > { %169 = sbr.rel (%p166_p3) target bundleno = 275 (0x113), region = 32  ;;  %1001 = vmatprep.subr.msk.bf16.mxu0 (!%p166_p3), %vm449_vm0, %v319_v0  ;;  %1002 = vmatprep.subr.msk.bf16.mxu1 (!%p166_p3), %vm449_vm0, %v319_v0  ;;  %v451_v1 = vsel (!%p166_p3), %vm449_vm0, %v319_v0, 0  ;;  %p1115_p4 = scmp.lt.s32.totalorder (!%p166_p3), %s909_s18, 63  ;;  %225 = vst.msk [vmem:[#allocation2 + $0x10] sm:$0xff] (!%p166_p3), %vm222_vm1, %v1068_v2  ;;  %223 = vst.msk [vmem:[#allocation2] sm:$0xff] (!%p166_p3), %vm222_vm1, %v1068_v2  ;;  %vm400_vm2 = vcmask (!%p166_p3), 31744  }
   0x8   : > { %966 = vmatpush3.bf16.msra.mxu0 (!%p166_p3), %v451_v1  ;;  %1000 = vmatpush3.bf16.msra.mxu1 (!%p166_p3), %v451_v1  ;;  %224 = vst.msk [vmem:[#allocation2 + $0x8] sm:$0xff] (!%p166_p3), %vm222_vm1, %v1068_v2  ;;  %226 = vst.msk [vmem:[#allocation2 + $0x18] sm:$0xff] (!%p166_p3), %vm222_vm1, %v1068_v2  ;;  %v1206_v46 = vld [vmem:[%s1345_s2] ss:$0 sm:$0xff] (!%p166_p3) }
   0x9   : > { %227 = vst.msk [vmem:[#allocation2 + $0x20] sm:$0xff] (!%p166_p3), %vm222_vm1, %v1068_v2  ;;  %228 = vst.msk [vmem:[#allocation2 + $0x28] sm:$0xff] (!%p166_p3), %vm222_vm1, %v1068_v2 }
   0xa   : > { %229 = vst.msk [vmem:[#allocation2 + $0x30] sm:$0xff] (!%p166_p3), %vm222_vm1, %v1068_v2  ;;  %230 = vst.msk [vmem:[#allocation2 + $0x38] sm:$0xff] (!%p166_p3), %vm222_vm1, %v1068_v2 }
   0xb   : > { %231 = vst.msk [vmem:[#allocation2 + $0x40] sm:$0xff] (!%p166_p3), %vm222_vm1, %v1068_v2  ;;  %232 = vst.msk [vmem:[#allocation2 + $0x48] sm:$0xff] (!%p166_p3), %vm222_vm1, %v1068_v2 }
   0xc   : > { %233 = vst.msk [vmem:[#allocation2 + $0x50] sm:$0xff] (!%p166_p3), %vm222_vm1, %v1068_v2  ;;  %234 = vst.msk [vmem:[#allocation2 + $0x58] sm:$0xff] (!%p166_p3), %vm222_vm1, %v1068_v2 }
   0xd   : > { %235 = vst.msk [vmem:[#allocation2 + $0x60] sm:$0xff] (!%p166_p3), %vm222_vm1, %v1068_v2  ;;  %236 = vst.msk [vmem:[#allocation2 + $0x68] sm:$0xff] (!%p166_p3), %vm222_vm1, %v1068_v2 }
   0xe   : > { %237 = vst.msk [vmem:[#allocation2 + $0x70] sm:$0xff] %vm222_vm1, %v1068_v2  ;;  %238 = vst.msk [vmem:[#allocation2 + $0x78] sm:$0xff] %vm222_vm1, %v1068_v2  ;;  %s1353_s18 = smov (!%p1115_p4, %s909_s18), 63  ;;  %v257_v19 = vld [vmem:[#allocation2 + $0x10] sm:$0xff]  ;;  %v255_v21 = vld [vmem:[#allocation2] sm:$0xff] }
   0xf   : > { %239 = vst.msk [vmem:[#allocation2 + $0x80] sm:$0xff] %vm222_vm1, %v1068_v2  ;;  %240 = vst.msk [vmem:[#allocation2 + $0x88] sm:$0xff] %vm222_vm1, %v1068_v2  ;;  %s910_s20 = sshll.u32 %s1353_s18, 2  ;;  %v258_v24 = vld [vmem:[#allocation2 + $0x18] sm:$0xff]  ;;  %v256_v29 = vld [vmem:[#allocation2 + $0x8] sm:$0xff]  ;;  %s912_s26 = sshll.u32 %s1353_s18, 3 }
  0x10   : > { %241 = vst.msk [vmem:[#allocation2 + $0x90] sm:$0xff] %vm222_vm1, %v1068_v2  ;;  %242 = vst.msk [vmem:[#allocation2 + $0x98] sm:$0xff] %vm222_vm1, %v1068_v2  ;;  %s1161_s23 = scalar_lea.vmem %s1343_s0, %s910_s20  ;;  %v259_v45 = vld [vmem:[#allocation2 + $0x20] sm:$0xff]  ;;  %v260_v54 = vld [vmem:[#allocation2 + $0x28] sm:$0xff]  ;;  %s1214_s29 = scalar_lea.vmem %s1346_s3, %s912_s26 }
  0x11   : > { %243 = vst.msk [vmem:[#allocation2 + $0xa0] sm:$0xff] %vm222_vm1, %v1068_v2  ;;  %244 = vst.msk [vmem:[#allocation2 + $0xa8] sm:$0xff] %vm222_vm1, %v1068_v2  ;;  %v1028_v3 = vld [vmem:[%s1161_s23] sm:$0xff]   ;;  %v1030_v5 = vld [vmem:[%s1161_s23 + $0x8] sm:$0xff]  }
  0x12   : > { %245 = vst.msk [vmem:[#allocation2 + $0xb0] sm:$0xff] %vm222_vm1, %v1068_v2  ;;  %246 = vst.msk [vmem:[#allocation2 + $0xb8] sm:$0xff] %vm222_vm1, %v1068_v2  ;;  %v1029_v4 = vld [vmem:[%s1161_s23 + $0x40] sm:$0xff]   ;;  %967 = vmatprep.mubr.msk.bf16.mxu0 %vm400_vm2, %v1028_v3  ;;  %v1031_v6 = vld [vmem:[%s1161_s23 + $0x48] sm:$0xff]  }
  0x13   : > { %247 = vst.msk [vmem:[#allocation2 + $0xc0] sm:$0xff] %vm222_vm1, %v1068_v2  ;;  %248 = vst.msk [vmem:[#allocation2 + $0xc8] sm:$0xff] %vm222_vm1, %v1068_v2  ;;  %983 = vmatprep.mubr.msk.bf16.mxu1 %vm400_vm2, %v1029_v4  ;;  %968 = vmatmul.mubr.msk.bf16.vlgmr.msra.gmra.mrb[0].mxu0 %vm400_vm2, %v1030_v5  ;;  %v1032_v7 = vld [vmem:[%s1161_s23 + $0x10] sm:$0xff]   ;;  %v1034_v9 = vld [vmem:[%s1161_s23 + $0x18] sm:$0xff]  }
  0x14   : > { %249 = vst.msk [vmem:[#allocation2 + $0xd0] sm:$0xff] %vm222_vm1, %v1068_v2  ;;  %250 = vst.msk [vmem:[#allocation2 + $0xd8] sm:$0xff] %vm222_vm1, %v1068_v2  ;;  %984 = vmatmul.mubr.msk.bf16.vlgmr.msra.gmra.mrb[0].mxu1 %vm400_vm2, %v1031_v6  ;;  %v1033_v8 = vld [vmem:[%s1161_s23 + $0x50] sm:$0xff]   ;;  %971 = vmatprep.mubr.msk.bf16.mxu0 %vm400_vm2, %v1032_v7  ;;  %v1035_v10 = vld [vmem:[%s1161_s23 + $0x58] sm:$0xff]  }
  0x15   : > { %251 = vst.msk [vmem:[#allocation2 + $0xe0] sm:$0xff] %vm222_vm1, %v1068_v2  ;;  %252 = vst.msk [vmem:[#allocation2 + $0xe8] sm:$0xff] %vm222_vm1, %v1068_v2  ;;  %987 = vmatprep.mubr.msk.bf16.mxu1 %vm400_vm2, %v1033_v8  ;;  %v1036_v11 = vld [vmem:[%s1161_s23 + $0x20] sm:$0xff]   ;;  %v1038_v13 = vld [vmem:[%s1161_s23 + $0x28] sm:$0xff]  }
  0x16   : > { %253 = vst.msk [vmem:[#allocation2 + $0xf0] sm:$0xff] %vm222_vm1, %v1068_v2  ;;  %254 = vst.msk [vmem:[#allocation2 + $0xf8] sm:$0xff] %vm222_vm1, %v1068_v2  ;;  %v1037_v12 = vld [vmem:[%s1161_s23 + $0x60] sm:$0xff]   ;;  %v1039_v14 = vld [vmem:[%s1161_s23 + $0x68] sm:$0xff]  }
  0x17   : > { %v1040_v15 = vld [vmem:[%s1161_s23 + $0x30] sm:$0xff]   ;;  %v1042_v17 = vld [vmem:[%s1161_s23 + $0x38] sm:$0xff]   ;;  %v271_v23 = vld [vmem:[#allocation2 + $0x80] sm:$0xff] }
  0x18   : > { %v1041_v16 = vld [vmem:[%s1161_s23 + $0x70] sm:$0xff]   ;;  %v1043_v18 = vld [vmem:[%s1161_s23 + $0x78] sm:$0xff]   ;;  %v272_v34 = vld [vmem:[#allocation2 + $0x88] sm:$0xff] }
  0x19   : > { %v273_v20 = vld [vmem:[#allocation2 + $0x90] sm:$0xff]  ;;  %v274_v28 = vld [vmem:[#allocation2 + $0x98] sm:$0xff]  ;;  %v275_v48 = vld [vmem:[#allocation2 + $0xa0] sm:$0xff] }
  0x1a   : > { %v261_v43 = vld [vmem:[#allocation2 + $0x30] sm:$0xff]  ;;  %v262_v49 = vld [vmem:[#allocation2 + $0x38] sm:$0xff]  ;;  %v276_v60 = vld [vmem:[#allocation2 + $0xa8] sm:$0xff] }
  0x1b   : > { %972 = vmatmul.mubr.msk.bf16.gmra.mrb[4].mxu0 %vm400_vm2, %v1034_v9  ;;  %v277_v44 = vld [vmem:[#allocation2 + $0xb0] sm:$0xff]  ;;  %v278_v53 = vld [vmem:[#allocation2 + $0xb8] sm:$0xff] }
  0x1c   : > { %988 = vmatmul.mubr.msk.bf16.gmra.mrb[4].mxu1 %vm400_vm2, %v1035_v10  ;;  %975 = vmatprep.mubr.msk.bf16.mxu0 %vm400_vm2, %v1036_v11 }
  0x1d   : > { %991 = vmatprep.mubr.msk.bf16.mxu1 %vm400_vm2, %v1037_v12 }
  0x23   : > { %976 = vmatmul.mubr.msk.bf16.gmra.mrb[8].mxu0 %vm400_vm2, %v1038_v13 }
  0x24   : > { %992 = vmatmul.mubr.msk.bf16.gmra.mrb[8].mxu1 %vm400_vm2, %v1039_v14  ;;  %979 = vmatprep.mubr.msk.bf16.mxu0 %vm400_vm2, %v1040_v15 }
  0x25   : > { %995 = vmatprep.mubr.msk.bf16.mxu1 %vm400_vm2, %v1041_v16 }
  0x2b   : > { %980 = vmatmul.mubr.msk.bf16.gmra.mrb[12].mxu0 %vm400_vm2, %v1042_v17 }
  0x2c   : > { %996 = vmatmul.mubr.msk.bf16.gmra.mrb[12].mxu1 %vm400_vm2, %v1043_v18 }
  0xe6   : > { %v969_v22 = vpop.f32.mrb[0].mxu0 }
  0xe7   : > { %v616_v25 = vadd.f32 %v969_v22, %v257_v19  ;;  %v985_v26 = vpop.f32.mrb[0].mxu1  ;;  %v487_v27 = vpop.f32.mrb[1].mxu0  ;;  %v265_v22 = vld [vmem:[#allocation2 + $0x50] sm:$0xff] }
  0xe8   : > { %v632_v30 = vadd.f32 %v985_v26, %v273_v20  ;;  %v614_v31 = vadd.f32 %v487_v27, %v255_v21  ;;  %v551_v32 = vpop.f32.mrb[1].mxu1  ;;  %v970_v33 = vpop.f32.mrb[2].mxu0  ;;  %v281_v26 = vld [vmem:[#allocation2 + $0xd0] sm:$0xff]  ;;  %v263_v27 = vld [vmem:[#allocation2 + $0x40] sm:$0xff] }
  0xe9   : > { %649 = vst.msk [vmem:[#allocation2 + $0x10] sm:$0xff] %vm222_vm1, %v616_v25  ;;  %v630_v35 = vadd.f32 %v551_v32, %v271_v23  ;;  %v617_v36 = vadd.f32 %v970_v33, %v258_v24  ;;  %v986_v37 = vpop.f32.mrb[2].mxu1  ;;  %v490_v38 = vpop.f32.mrb[3].mxu0  ;;  %v266_v32 = vld [vmem:[#allocation2 + $0x58] sm:$0xff] }
  0xea   : > { %665 = vst.msk [vmem:[#allocation2 + $0x90] sm:$0xff] %vm222_vm1, %v632_v30  ;;  %647 = vst.msk [vmem:[#allocation2] sm:$0xff] %vm222_vm1, %v614_v31  ;;  %v633_v39 = vadd.f32 %v986_v37, %v274_v28  ;;  %v615_v40 = vadd.f32 %v490_v38, %v256_v29  ;;  %v554_v41 = vpop.f32.mrb[3].mxu1  ;;  %v279_v31 = vld [vmem:[#allocation2 + $0xc0] sm:$0xff]  ;;  %v282_v37 = vld [vmem:[#allocation2 + $0xd8] sm:$0xff] }
  0xeb   : > { %663 = vst.msk [vmem:[#allocation2 + $0x80] sm:$0xff] %vm222_vm1, %v630_v35  ;;  %650 = vst.msk [vmem:[#allocation2 + $0x18] sm:$0xff] %vm222_vm1, %v617_v36  ;;  %v631_v42 = vadd.f32 %v554_v41, %v272_v34  ;;  %v264_v38 = vld [vmem:[#allocation2 + $0x48] sm:$0xff] }
  0xec   : > { %666 = vst.msk [vmem:[#allocation2 + $0x98] sm:$0xff] %vm222_vm1, %v633_v39  ;;  %648 = vst.msk [vmem:[#allocation2 + $0x8] sm:$0xff] %vm222_vm1, %v615_v40 }
  0xed   : > { %664 = vst.msk [vmem:[#allocation2 + $0x88] sm:$0xff] %vm222_vm1, %v631_v42 }
  0xee   : > { %v973_v47 = vpop.f32.mrb[4].mxu0 }
  0xef   : > { %v620_v50 = vadd.f32 %v973_v47, %v261_v43  ;;  %v989_v51 = vpop.f32.mrb[4].mxu1  ;;  %v503_v52 = vpop.f32.mrb[5].mxu0 }
  0xf0   : > { %v684_v55 = vld [vmem:[#allocation2 + $0x10] sm:$0xff]  ;;  %v636_v56 = vadd.f32 %v989_v51, %v277_v44  ;;  %v618_v57 = vadd.f32 %v503_v52, %v259_v45  ;;  %v567_v58 = vpop.f32.mrb[5].mxu1  ;;  %v974_v59 = vpop.f32.mrb[6].mxu0  ;;  %v280_v44 = vld [vmem:[#allocation2 + $0xc8] sm:$0xff] }
  0xf1   : > { %v723_v61 = vadd.f32 %v1206_v46, %v684_v55  ;;  %v700_v62 = vld [vmem:[#allocation2 + $0x90] sm:$0xff]  ;;  %v682_v63 = vld [vmem:[#allocation2] sm:$0xff]  ;;  %653 = vst.msk [vmem:[#allocation2 + $0x30] sm:$0xff] %vm222_vm1, %v620_v50  ;;  %v634_v0 = vadd.f32 %v567_v58, %v275_v48  ;;  %v621_v1 = vadd.f32 %v974_v59, %v262_v49  ;;  %v990_v2 = vpop.f32.mrb[6].mxu1  ;;  %v506_v3 = vpop.f32.mrb[7].mxu0 }
  0xf2   : > { %v739_v4 = vadd.f32 %v1206_v46, %v700_v62  ;;  %v721_v5 = vadd.f32 %v1206_v46, %v682_v63  ;;  %v698_v6 = vld [vmem:[#allocation2 + $0x80] sm:$0xff]  ;;  %v685_v7 = vld [vmem:[#allocation2 + $0x18] sm:$0xff]  ;;  %669 = vst.msk [vmem:[#allocation2 + $0xb0] sm:$0xff] %vm222_vm1, %v636_v56  ;;  %651 = vst.msk [vmem:[#allocation2 + $0x20] sm:$0xff] %vm222_vm1, %v618_v57  ;;  %v637_v8 = vadd.f32 %v990_v2, %v278_v53  ;;  %v570_v10 = vpop.f32.mrb[7].mxu1 }
  0xf3   : > { %v619_v9 = vadd.f32 %v506_v3, %v260_v54  ;;  %v755_v11 = vmax.f32 %v723_v61, 0.0  ;;  %v737_v12 = vadd.f32 %v1206_v46, %v698_v6  ;;  %v724_v13 = vadd.f32 %v1206_v46, %v685_v7  ;;  %v701_v14 = vld [vmem:[#allocation2 + $0x98] sm:$0xff]  ;;  %v683_v15 = vld [vmem:[#allocation2 + $0x8] sm:$0xff]  ;;  %667 = vst.msk [vmem:[#allocation2 + $0xa0] sm:$0xff] %vm222_vm1, %v634_v0  ;;  %654 = vst.msk [vmem:[#allocation2 + $0x38] sm:$0xff] %vm222_vm1, %v621_v1 }
  0xf4   : > { %v635_v16 = vadd.f32 %v570_v10, %v276_v60  ;;  %v771_v17 = vmax.f32 %v739_v4, 0.0  ;;  %v753_v18 = vmax.f32 %v721_v5, 0.0  ;;  %v740_v19 = vadd.f32 %v1206_v46, %v701_v14  ;;  %v699_v21 = vld [vmem:[#allocation2 + $0x88] sm:$0xff]  ;;  %670 = vst.msk [vmem:[#allocation2 + $0xb8] sm:$0xff] %vm222_vm1, %v637_v8  ;;  %v269_v7 = vld [vmem:[#allocation2 + $0x70] sm:$0xff] }
  0xf5   : > { %v722_v20 = vadd.f32 %v1206_v46, %v683_v15  ;;  %652 = vst.msk [vmem:[#allocation2 + $0x28] sm:$0xff] %vm222_vm1, %v619_v9  ;;  %787 = vst.msk [vmem:[%s1214_s29 + $0x10] sm:$0xff] %vm222_vm1, %v755_v11  ;;  %v769_v23 = vmax.f32 %v737_v12, 0.0  ;;  %v756_v24 = vmax.f32 %v724_v13, 0.0  ;;  %v738_v25 = vadd.f32 %v1206_v46, %v699_v21  ;;  %v285_v11 = vld [vmem:[#allocation2 + $0xf0] sm:$0xff]  ;;  %v267_v12 = vld [vmem:[#allocation2 + $0x60] sm:$0xff] }
  0xf6   : > { %668 = vst.msk [vmem:[#allocation2 + $0xa8] sm:$0xff] %vm222_vm1, %v635_v16  ;;  %803 = vst.msk [vmem:[%s1214_s29 + $0x90] sm:$0xff] %vm222_vm1, %v771_v17  ;;  %v772_v28 = vmax.f32 %v740_v19, 0.0  ;;  %v977_v30 = vpop.f32.mrb[8].mxu0  ;;  %v283_v16 = vld [vmem:[#allocation2 + $0xe0] sm:$0xff]  ;;  %v270_v17 = vld [vmem:[#allocation2 + $0x78] sm:$0xff] }
  0xf7   : > { %785 = vst.msk [vmem:[%s1214_s29] sm:$0xff] %vm222_vm1, %v753_v18  ;;  %v754_v29 = vmax.f32 %v722_v20, 0.0  ;;  %801 = vst.msk [vmem:[%s1214_s29 + $0x80] sm:$0xff] %vm222_vm1, %v769_v23  ;;  %v770_v33 = vmax.f32 %v738_v25, 0.0  ;;  %v624_v34 = vadd.f32 %v977_v30, %v265_v22  ;;  %v993_v35 = vpop.f32.mrb[8].mxu1  ;;  %v519_v36 = vpop.f32.mrb[9].mxu0 }
  0xf8   : > { %788 = vst.msk [vmem:[%s1214_s29 + $0x18] sm:$0xff] %vm222_vm1, %v756_v24  ;;  %804 = vst.msk [vmem:[%s1214_s29 + $0x98] sm:$0xff] %vm222_vm1, %v772_v28  ;;  %v688_v39 = vld [vmem:[#allocation2 + $0x30] sm:$0xff]  ;;  %v640_v40 = vadd.f32 %v993_v35, %v281_v26  ;;  %v622_v41 = vadd.f32 %v519_v36, %v263_v27  ;;  %v583_v42 = vpop.f32.mrb[9].mxu1  ;;  %v978_v43 = vpop.f32.mrb[10].mxu0  ;;  %v286_v22 = vld [vmem:[#allocation2 + $0xf8] sm:$0xff] }
  0xf9   : > { %786 = vst.msk [vmem:[%s1214_s29 + $0x8] sm:$0xff] %vm222_vm1, %v754_v29  ;;  %802 = vst.msk [vmem:[%s1214_s29 + $0x88] sm:$0xff] %vm222_vm1, %v770_v33  ;;  %v727_v45 = vadd.f32 %v1206_v46, %v688_v39  ;;  %v704_v47 = vld [vmem:[#allocation2 + $0xb0] sm:$0xff]  ;;  %v686_v48 = vld [vmem:[#allocation2 + $0x20] sm:$0xff]  ;;  %v638_v49 = vadd.f32 %v583_v42, %v279_v31  ;;  %v625_v50 = vadd.f32 %v978_v43, %v266_v32  ;;  %v994_v51 = vpop.f32.mrb[10].mxu1  ;;  %v522_v52 = vpop.f32.mrb[11].mxu0 }
  0xfa   : > { %657 = vst.msk [vmem:[#allocation2 + $0x50] sm:$0xff] %vm222_vm1, %v624_v34  ;;  %v743_v53 = vadd.f32 %v1206_v46, %v704_v47  ;;  %v725_v54 = vadd.f32 %v1206_v46, %v686_v48  ;;  %v702_v55 = vld [vmem:[#allocation2 + $0xa0] sm:$0xff]  ;;  %v689_v56 = vld [vmem:[#allocation2 + $0x38] sm:$0xff]  ;;  %673 = vst.msk [vmem:[#allocation2 + $0xd0] sm:$0xff] %vm222_vm1, %v640_v40  ;;  %v641_v57 = vadd.f32 %v994_v51, %v282_v37  ;;  %v586_v59 = vpop.f32.mrb[11].mxu1 }
  0xfb   : > { %655 = vst.msk [vmem:[#allocation2 + $0x40] sm:$0xff] %vm222_vm1, %v622_v41  ;;  %v623_v58 = vadd.f32 %v522_v52, %v264_v38  ;;  %v759_v60 = vmax.f32 %v727_v45, 0.0  ;;  %v741_v61 = vadd.f32 %v1206_v46, %v702_v55  ;;  %v728_v62 = vadd.f32 %v1206_v46, %v689_v56  ;;  %v705_v63 = vld [vmem:[#allocation2 + $0xb8] sm:$0xff]  ;;  %671 = vst.msk [vmem:[#allocation2 + $0xc0] sm:$0xff] %vm222_vm1, %v638_v49  ;;  %v268_v23 = vld [vmem:[#allocation2 + $0x68] sm:$0xff] }
  0xfc   : > { %v687_v0 = vld [vmem:[#allocation2 + $0x28] sm:$0xff]  ;;  %658 = vst.msk [vmem:[#allocation2 + $0x58] sm:$0xff] %vm222_vm1, %v625_v50  ;;  %v639_v1 = vadd.f32 %v586_v59, %v280_v44  ;;  %v775_v2 = vmax.f32 %v743_v53, 0.0  ;;  %v757_v3 = vmax.f32 %v725_v54, 0.0  ;;  %v744_v4 = vadd.f32 %v1206_v46, %v705_v63  ;;  %674 = vst.msk [vmem:[#allocation2 + $0xd8] sm:$0xff] %vm222_vm1, %v641_v57 }
  0xfd   : > { %v726_v5 = vadd.f32 %v1206_v46, %v687_v0  ;;  %v703_v6 = vld [vmem:[#allocation2 + $0xa8] sm:$0xff]  ;;  %656 = vst.msk [vmem:[#allocation2 + $0x48] sm:$0xff] %vm222_vm1, %v623_v58  ;;  %791 = vst.msk [vmem:[%s1214_s29 + $0x30] sm:$0xff] %vm222_vm1, %v759_v60  ;;  %v773_v8 = vmax.f32 %v741_v61, 0.0  ;;  %v760_v9 = vmax.f32 %v728_v62, 0.0 }
  0xfe   : > { %v742_v10 = vadd.f32 %v1206_v46, %v703_v6  ;;  %672 = vst.msk [vmem:[#allocation2 + $0xc8] sm:$0xff] %vm222_vm1, %v639_v1  ;;  %807 = vst.msk [vmem:[%s1214_s29 + $0xb0] sm:$0xff] %vm222_vm1, %v775_v2  ;;  %v776_v13 = vmax.f32 %v744_v4, 0.0  ;;  %v981_v15 = vpop.f32.mrb[12].mxu0  ;;  %v284_v29 = vld [vmem:[#allocation2 + $0xe8] sm:$0xff] }
  0xff   : > { %789 = vst.msk [vmem:[%s1214_s29 + $0x20] sm:$0xff] %vm222_vm1, %v757_v3  ;;  %v758_v14 = vmax.f32 %v726_v5, 0.0  ;;  %805 = vst.msk [vmem:[%s1214_s29 + $0xa0] sm:$0xff] %vm222_vm1, %v773_v8  ;;  %v628_v19 = vadd.f32 %v981_v15, %v269_v7  ;;  %v997_v20 = vpop.f32.mrb[12].mxu1  ;;  %v535_v21 = vpop.f32.mrb[13].mxu0 }
 0x100   : > { %792 = vst.msk [vmem:[%s1214_s29 + $0x38] sm:$0xff] %vm222_vm1, %v760_v9  ;;  %v774_v18 = vmax.f32 %v742_v10, 0.0  ;;  %808 = vst.msk [vmem:[%s1214_s29 + $0xb8] sm:$0xff] %vm222_vm1, %v776_v13  ;;  %v644_v25 = vadd.f32 %v997_v20, %v285_v11  ;;  %v626_v26 = vadd.f32 %v535_v21, %v267_v12  ;;  %v599_v27 = vpop.f32.mrb[13].mxu1  ;;  %v982_v28 = vpop.f32.mrb[14].mxu0 }
 0x101   : > { %790 = vst.msk [vmem:[%s1214_s29 + $0x28] sm:$0xff] %vm222_vm1, %v758_v14  ;;  %v692_v24 = vld [vmem:[#allocation2 + $0x50] sm:$0xff]  ;;  %661 = vst.msk [vmem:[#allocation2 + $0x70] sm:$0xff] %vm222_vm1, %v628_v19  ;;  %v642_v33 = vadd.f32 %v599_v27, %v283_v16  ;;  %v629_v34 = vadd.f32 %v982_v28, %v270_v17  ;;  %v998_v35 = vpop.f32.mrb[14].mxu1  ;;  %v538_v36 = vpop.f32.mrb[15].mxu0 }
 0x102   : > { %806 = vst.msk [vmem:[%s1214_s29 + $0xa8] sm:$0xff] %vm222_vm1, %v774_v18  ;;  %v731_v30 = vadd.f32 %v1206_v46, %v692_v24  ;;  %v708_v31 = vld [vmem:[#allocation2 + $0xd0] sm:$0xff]  ;;  %v690_v32 = vld [vmem:[#allocation2 + $0x40] sm:$0xff]  ;;  %677 = vst.msk [vmem:[#allocation2 + $0xf0] sm:$0xff] %vm222_vm1, %v644_v25  ;;  %v645_v41 = vadd.f32 %v998_v35, %v286_v22  ;;  %v627_v42 = vadd.f32 %v538_v36, %v268_v23  ;;  %v602_v43 = vpop.f32.mrb[15].mxu1 }
 0x103   : > { %v747_v37 = vadd.f32 %v1206_v46, %v708_v31  ;;  %v729_v38 = vadd.f32 %v1206_v46, %v690_v32  ;;  %v706_v39 = vld [vmem:[#allocation2 + $0xc0] sm:$0xff]  ;;  %v693_v40 = vld [vmem:[#allocation2 + $0x58] sm:$0xff]  ;;  %659 = vst.msk [vmem:[#allocation2 + $0x60] sm:$0xff] %vm222_vm1, %v626_v26  ;;  %675 = vst.msk [vmem:[#allocation2 + $0xe0] sm:$0xff] %vm222_vm1, %v642_v33  ;;  %v643_v50 = vadd.f32 %v602_v43, %v284_v29 }
 0x104   : > { %v763_v44 = vmax.f32 %v731_v30, 0.0  ;;  %v745_v45 = vadd.f32 %v1206_v46, %v706_v39  ;;  %v732_v47 = vadd.f32 %v1206_v46, %v693_v40  ;;  %v709_v48 = vld [vmem:[#allocation2 + $0xd8] sm:$0xff]  ;;  %v691_v49 = vld [vmem:[#allocation2 + $0x48] sm:$0xff]  ;;  %662 = vst.msk [vmem:[#allocation2 + $0x78] sm:$0xff] %vm222_vm1, %v629_v34  ;;  %678 = vst.msk [vmem:[#allocation2 + $0xf8] sm:$0xff] %vm222_vm1, %v645_v41 }
 0x105   : > { %v779_v51 = vmax.f32 %v747_v37, 0.0  ;;  %v761_v52 = vmax.f32 %v729_v38, 0.0  ;;  %v748_v53 = vadd.f32 %v1206_v46, %v709_v48  ;;  %v730_v54 = vadd.f32 %v1206_v46, %v691_v49  ;;  %v707_v55 = vld [vmem:[#allocation2 + $0xc8] sm:$0xff]  ;;  %660 = vst.msk [vmem:[#allocation2 + $0x68] sm:$0xff] %vm222_vm1, %v627_v42  ;;  %676 = vst.msk [vmem:[#allocation2 + $0xe8] sm:$0xff] %vm222_vm1, %v643_v50 }
 0x106   : > { %795 = vst.msk [vmem:[%s1214_s29 + $0x50] sm:$0xff] %vm222_vm1, %v763_v44  ;;  %v777_v56 = vmax.f32 %v745_v45, 0.0  ;;  %v764_v57 = vmax.f32 %v732_v47, 0.0  ;;  %v746_v58 = vadd.f32 %v1206_v46, %v707_v55 }
 0x107   : > { %811 = vst.msk [vmem:[%s1214_s29 + $0xd0] sm:$0xff] %vm222_vm1, %v779_v51  ;;  %793 = vst.msk [vmem:[%s1214_s29 + $0x40] sm:$0xff] %vm222_vm1, %v761_v52  ;;  %v780_v59 = vmax.f32 %v748_v53, 0.0  ;;  %v762_v60 = vmax.f32 %v730_v54, 0.0 }
 0x108   : > { %809 = vst.msk [vmem:[%s1214_s29 + $0xc0] sm:$0xff] %vm222_vm1, %v777_v56  ;;  %796 = vst.msk [vmem:[%s1214_s29 + $0x58] sm:$0xff] %vm222_vm1, %v764_v57  ;;  %v778_v61 = vmax.f32 %v746_v58, 0.0  ;;  %v696_v62 = vld [vmem:[#allocation2 + $0x70] sm:$0xff] }
 0x109   : > { %812 = vst.msk [vmem:[%s1214_s29 + $0xd8] sm:$0xff] %vm222_vm1, %v780_v59  ;;  %794 = vst.msk [vmem:[%s1214_s29 + $0x48] sm:$0xff] %vm222_vm1, %v762_v60  ;;  %v735_v63 = vadd.f32 %v1206_v46, %v696_v62  ;;  %v712_v0 = vld [vmem:[#allocation2 + $0xf0] sm:$0xff] }
 0x10a   : > { %810 = vst.msk [vmem:[%s1214_s29 + $0xc8] sm:$0xff] %vm222_vm1, %v778_v61  ;;  %v694_v1 = vld [vmem:[#allocation2 + $0x60] sm:$0xff]  ;;  %v751_v2 = vadd.f32 %v1206_v46, %v712_v0 }
 0x10b   : > { %v733_v3 = vadd.f32 %v1206_v46, %v694_v1  ;;  %v710_v4 = vld [vmem:[#allocation2 + $0xe0] sm:$0xff]  ;;  %v697_v5 = vld [vmem:[#allocation2 + $0x78] sm:$0xff]  ;;  %v767_v6 = vmax.f32 %v735_v63, 0.0 }
 0x10c   : > { %v749_v7 = vadd.f32 %v1206_v46, %v710_v4  ;;  %v736_v8 = vadd.f32 %v1206_v46, %v697_v5  ;;  %v713_v9 = vld [vmem:[#allocation2 + $0xf8] sm:$0xff]  ;;  %v695_v10 = vld [vmem:[#allocation2 + $0x68] sm:$0xff]  ;;  %v783_v11 = vmax.f32 %v751_v2, 0.0 }
 0x10d   : > { %v765_v12 = vmax.f32 %v733_v3, 0.0  ;;  %v752_v13 = vadd.f32 %v1206_v46, %v713_v9  ;;  %v734_v14 = vadd.f32 %v1206_v46, %v695_v10  ;;  %v711_v15 = vld [vmem:[#allocation2 + $0xe8] sm:$0xff]  ;;  %799 = vst.msk [vmem:[%s1214_s29 + $0x70] sm:$0xff] %vm222_vm1, %v767_v6 }
 0x10e   : > { %v781_v16 = vmax.f32 %v749_v7, 0.0  ;;  %v768_v17 = vmax.f32 %v736_v8, 0.0  ;;  %v750_v18 = vadd.f32 %v1206_v46, %v711_v15  ;;  %815 = vst.msk [vmem:[%s1214_s29 + $0xf0] sm:$0xff] %vm222_vm1, %v783_v11 }
 0x10f   : > { %797 = vst.msk [vmem:[%s1214_s29 + $0x60] sm:$0xff] %vm222_vm1, %v765_v12  ;;  %v784_v19 = vmax.f32 %v752_v13, 0.0  ;;  %v766_v20 = vmax.f32 %v734_v14, 0.0 }
 0x110   : > { %813 = vst.msk [vmem:[%s1214_s29 + $0xe0] sm:$0xff] %vm222_vm1, %v781_v16  ;;  %800 = vst.msk [vmem:[%s1214_s29 + $0x78] sm:$0xff] %vm222_vm1, %v768_v17  ;;  %v782_v21 = vmax.f32 %v750_v18, 0.0 }
 0x111   : > { %816 = vst.msk [vmem:[%s1214_s29 + $0xf8] sm:$0xff] %vm222_vm1, %v784_v19  ;;  %798 = vst.msk [vmem:[%s1214_s29 + $0x68] sm:$0xff] %vm222_vm1, %v766_v20 }
 0x112   : > { %814 = vst.msk [vmem:[%s1214_s29 + $0xe8] sm:$0xff] %vm222_vm1, %v782_v21 }
 0x113 PF: > { %s13_s14 = sadd.s32 1, %s1066_s14   ;;  %s1348_s12 = smov %s1062_s13 }
 0x114   : > { %p10_p5 = scmp.ge.s32.totalorder %s13_s14, 4   ;;  %s1349_s13 = smov %s1351_s15 }
 0x116   :  { %12 = sbr.rel (!%p10_p5) target bundleno = 2 (0x2), region = 73 }

</bundles_post_ra>
